<compile_context>
chip_gen: v5e
topology: v5e:2x2
jax: 0.10.0
libtpu: 0.0.40
codegen_flags: <defaults>
</compile_context>

<pallas_src>
import functools

import jax
import jax.numpy as jnp
from jax import lax
from jax.experimental import pallas as pl
from jax.experimental.pallas import tpu as pltpu

NODE_FEATURES = 100
INPUT_SIZE = 32
NUM_CLASSES = 10

FEAT_PAD = 128     # node-feature axis padded 100 -> 128 (lane aligned)
CLASS_PAD = 128    # class axis padded 10 -> 128 (lane-dense output stores)
ROW_ALIGN = 256    # node-count padding granularity (decoupled from TK)

ADJ_TILE_BUDGET_BYTES = 8 * 1024 * 1024      # double-buffered bf16 adjacency tile
XW_RESIDENT_BUDGET_BYTES = 16 * 1024 * 1024  # (possibly double-buffered) resident XW slab
VMEM_LIMIT_BYTES = 48 * 1024 * 1024          # < 64 MiB physical on v7x, < 128 MiB on v5e/v6e


def _round_up(n, m):
    return ((n + m - 1) // m) * m


def _largest_aligned_divisor(n, cap, step=256):
    """Largest multiple of `step` that divides n and is <= cap (fallback: step)."""
    best = step
    t = step
    limit = min(cap, n)
    while t <= limit:
        if n % t == 0:
            best = t
        t += step
    return best


# ---------------------------------------------------------------------------
# Stage 1: XW_scaled = dinv[src] * (X @ Wg)   (computed once, bf16 output)
# ---------------------------------------------------------------------------
def xw_kernel(x_ref, wg_ref, dinv_ref, xw_ref):
    xw = jnp.dot(x_ref[...], wg_ref[...], preferred_element_type=jnp.float32)
    xw_ref[...] = (xw * dinv_ref[...]).astype(xw_ref.dtype)


# ---------------------------------------------------------------------------
# Stage 2: row/K-tiled aggregation + dinv[dst] + bias + ReLU + MLP + log_softmax
# ---------------------------------------------------------------------------
def gcn_agg_mlp_kernel(adj_ref, xw_ref, dinv_ref, bg_ref,
                       w1_ref, b1_ref, w2_ref, b2_ref, w3_ref, b3_ref,
                       out_ref, acc_ref, *, tk, xw_resident):
    k = pl.program_id(1)

    @pl.when(k == 0)
    def _():
        acc_ref[...] = jnp.zeros_like(acc_ref)

    if xw_resident:
        # Whole XW slab lives in VMEM (constant block index); slice the k-tile.
        start = pl.multiple_of(k * tk, 256)
        xw_blk = xw_ref[pl.ds(start, tk), :]
    else:
        xw_blk = xw_ref[...]

    # (A + I)[i-tile, k-tile] @ (dinv*XW)[k-tile] — bf16 inputs, f32 accumulation.
    acc_ref[...] += jnp.dot(adj_ref[...], xw_blk,
                            preferred_element_type=jnp.float32)

    @pl.when(k == pl.num_programs(1) - 1)
    def _():
        # Symmetric-normalization row scale (dinv[dst]) + GCNConv bias + ReLU.
        h = jnp.maximum(acc_ref[...] * dinv_ref[...] + bg_ref[...], 0.0)
        # F.dropout(x, training=self.training): eval semantics -> identity.
        # TODO(synk): stochastic dropout (training=True) not implemented.
        m1 = jnp.maximum(
            jnp.dot(h, w1_ref[...], preferred_element_type=jnp.float32) + b1_ref[...],
            0.0)
        m2 = jnp.maximum(
            jnp.dot(m1, w2_ref[...], preferred_element_type=jnp.float32) + b2_ref[...],
            0.0)
        logits = jnp.dot(m2, w3_ref[...],
                         preferred_element_type=jnp.float32) + b3_ref[...]

        # Padded class columns -> very negative so they vanish in softmax (f32 only).
        col = lax.broadcasted_iota(jnp.int32, logits.shape, 1)
        logits = jnp.where(col < NUM_CLASSES, logits, -1e30)

        # log_softmax over the class axis.
        mx = jnp.max(logits, axis=1, keepdims=True)
        shifted = logits - mx
        lse = jnp.log(jnp.sum(jnp.exp(shifted), axis=1, keepdims=True))
        out_ref[...] = shifted - lse


# ---------------------------------------------------------------------------
# Graph preprocessing (plain JAX glue; O(E) + one bf16 N^2 scatter)
# ---------------------------------------------------------------------------
def build_adjacency_and_dinv(edge_index, num_nodes, num_pad):
    """Raw (A + I)[dst, src] as bf16 counts plus D^{-1/2}[dst] as an (N,1) column.

    Normalization (dinv[dst] * A * dinv[src]) is folded into the Pallas kernels,
    so no N^2 f32 passes happen here. Padded rows/cols stay zero (dinv 0)."""
    src = edge_index[0]
    dst = edge_index[1]

    adj = jnp.zeros((num_pad, num_pad), jnp.bfloat16)
    adj = adj.at[dst, src].add(jnp.ones(src.shape, jnp.bfloat16))
    loop = jnp.arange(num_nodes, dtype=edge_index.dtype)
    adj = adj.at[loop, loop].add(jnp.ones((num_nodes,), jnp.bfloat16))

    deg = jnp.zeros((num_pad,), jnp.float32).at[dst].add(
        jnp.ones(dst.shape, jnp.float32))
    deg = deg + (jnp.arange(num_pad) < num_nodes).astype(jnp.float32)
    dinv = jnp.where(deg > 0, lax.rsqrt(deg), 0.0)
    return adj, dinv.reshape(num_pad, 1)


def init_params(key):
    ks = jax.random.split(key, 8)

    def lin(kw, fan_in, fan_out):
        bound = 1.0 / jnp.sqrt(fan_in)
        return jax.random.uniform(kw, (fan_in, fan_out), jnp.float32, -bound, bound)

    return {
        "wg": lin(ks[0], NODE_FEATURES, INPUT_SIZE),
        "bg": jnp.zeros((1, INPUT_SIZE), jnp.float32),
        "w1": lin(ks[1], INPUT_SIZE, INPUT_SIZE // 2),
        "b1": jax.random.uniform(ks[2], (1, INPUT_SIZE // 2), jnp.float32, -0.1, 0.1),
        "w2": lin(ks[3], INPUT_SIZE // 2, INPUT_SIZE // 4),
        "b2": jax.random.uniform(ks[4], (1, INPUT_SIZE // 4), jnp.float32, -0.1, 0.1),
        "w3": lin(ks[5], INPUT_SIZE // 4, NUM_CLASSES),
        "b3": jax.random.uniform(ks[6], (1, NUM_CLASSES), jnp.float32, -0.1, 0.1),
    }


# ---------------------------------------------------------------------------
# Forward wrapper
# ---------------------------------------------------------------------------
def gcn_forward(x, edge_index, edge_weight, params):
    # edge_weight accepted but unused — matches `self.conv1(x, edge_index)`.
    del edge_weight
    n = x.shape[0]
    n_pad = _round_up(max(n, ROW_ALIGN), ROW_ALIGN)

    # ---- adaptive tile selection -------------------------------------------
    tm = 512 if n_pad % 512 == 0 else 256
    if n_pad // tm < 2:
        tm = max(128, tm // 2)          # keep >= 2 row tiles for v7x's 2 TensorCores
    tk_cap = max(256, (ADJ_TILE_BUDGET_BYTES // (4 * tm)) // 256 * 256)
    tk = _largest_aligned_divisor(n_pad, tk_cap)          # divides n_pad, 256-aligned
    tm1 = _largest_aligned_divisor(n_pad, 2048)           # Stage-1 row tile
    xw_resident = (n_pad * INPUT_SIZE * 2 * 2) <= XW_RESIDENT_BUDGET_BYTES

    # ---- operand padding / dtype prep (bf16 on the MXU, f32 accumulation) ---
    x_pad = jnp.zeros((n_pad, FEAT_PAD), jnp.bfloat16
                      ).at[:n, :NODE_FEATURES].set(x.astype(jnp.bfloat16))
    wg_pad = jnp.zeros((FEAT_PAD, INPUT_SIZE), jnp.bfloat16
                       ).at[:NODE_FEATURES, :].set(params["wg"].astype(jnp.bfloat16))
    w3_pad = jnp.zeros((INPUT_SIZE // 4, CLASS_PAD), jnp.float32
                       ).at[:, :NUM_CLASSES].set(params["w3"])
    b3_pad = jnp.zeros((1, CLASS_PAD), jnp.float32
                       ).at[:, :NUM_CLASSES].set(params["b3"])

    adj, dinv = build_adjacency_and_dinv(edge_index, n, n_pad)

    # ---- Stage 1: dinv[src] * (X @ Wg) (hoisted, bf16 output) ---------------
    xw = pl.pallas_call(
        xw_kernel,
        out_shape=jax.ShapeDtypeStruct((n_pad, INPUT_SIZE), jnp.bfloat16),
        grid=(n_pad // tm1,),
        in_specs=[
            pl.BlockSpec((tm1, FEAT_PAD), lambda i: (i, 0)),
            pl.BlockSpec((FEAT_PAD, INPUT_SIZE), lambda i: (0, 0)),
            pl.BlockSpec((tm1, 1), lambda i: (i, 0)),
        ],
        out_specs=pl.BlockSpec((tm1, INPUT_SIZE), lambda i: (i, 0)),
        compiler_params=pltpu.CompilerParams(
            dimension_semantics=("parallel",)),
    )(x_pad, wg_pad, dinv)

    # ---- Stage 2: tiled aggregation + fused MLP + log_softmax ---------------
    num_row_tiles = n_pad // tm
    num_k_tiles = n_pad // tk

    if xw_resident:
        xw_spec = pl.BlockSpec((n_pad, INPUT_SIZE), lambda i, k: (0, 0))
    else:
        xw_spec = pl.BlockSpec((tk, INPUT_SIZE), lambda i, k: (k, 0))

    cost = pl.CostEstimate(
        flops=int(2 * n_pad * n_pad * INPUT_SIZE
                  + 2 * n_pad * (INPUT_SIZE * (INPUT_SIZE // 2)
                                 + (INPUT_SIZE // 2) * (INPUT_SIZE // 4)
                                 + (INPUT_SIZE // 4) * CLASS_PAD)),
        transcendentals=int(n_pad * CLASS_PAD),
        bytes_accessed=int(n_pad * n_pad * 2            # bf16 adjacency
                           + n_pad * INPUT_SIZE * 2     # bf16 XW (once if resident)
                           + n_pad * CLASS_PAD * 4      # f32 output
                           + n_pad * 4),                # dinv
    )

    kernel = functools.partial(gcn_agg_mlp_kernel, tk=tk, xw_resident=xw_resident)

    out_pad = pl.pallas_call(
        kernel,
        out_shape=jax.ShapeDtypeStruct((n_pad, CLASS_PAD), jnp.float32),
        grid=(num_row_tiles, num_k_tiles),
        in_specs=[
            pl.BlockSpec((tm, tk), lambda i, k: (i, k)),                  # (A+I) tile
            xw_spec,                                                      # XW slab
            pl.BlockSpec((tm, 1), lambda i, k: (i, 0)),                   # dinv[dst]
            pl.BlockSpec((1, INPUT_SIZE), lambda i, k: (0, 0)),           # bg
            pl.BlockSpec((INPUT_SIZE, INPUT_SIZE // 2), lambda i, k: (0, 0)),
            pl.BlockSpec((1, INPUT_SIZE // 2), lambda i, k: (0, 0)),
            pl.BlockSpec((INPUT_SIZE // 2, INPUT_SIZE // 4), lambda i, k: (0, 0)),
            pl.BlockSpec((1, INPUT_SIZE // 4), lambda i, k: (0, 0)),
            pl.BlockSpec((INPUT_SIZE // 4, CLASS_PAD), lambda i, k: (0, 0)),
            pl.BlockSpec((1, CLASS_PAD), lambda i, k: (0, 0)),
        ],
        out_specs=pl.BlockSpec((tm, CLASS_PAD), lambda i, k: (i, 0)),
        scratch_shapes=[pltpu.VMEM((tm, INPUT_SIZE), jnp.float32)],
        compiler_params=pltpu.CompilerParams(
            dimension_semantics=("parallel", "arbitrary"),
            vmem_limit_bytes=VMEM_LIMIT_BYTES),
        cost_estimate=cost,
    )(adj, xw, dinv,
      params["bg"], params["w1"], params["b1"],
      params["w2"], params["b2"], w3_pad, b3_pad)

    return out_pad[:n, :NUM_CLASSES]


if __name__ == "__main__":
    key = jax.random.PRNGKey(0)
    k_x, k_e, k_w, k_p = jax.random.split(key, 4)

    num_nodes = 8
    num_edges = 16

    x = jax.random.normal(k_x, (num_nodes, NODE_FEATURES), jnp.float32)
    edge_index = jax.random.randint(k_e, (2, num_edges), 0, num_nodes, jnp.int32)
    edge_weight = jax.random.uniform(k_w, (num_edges,), jnp.float32)

    params = init_params(k_p)

    out = gcn_forward(x, edge_index, edge_weight, params)
    out = jax.block_until_ready(out)

    assert out.shape == (num_nodes, NUM_CLASSES)
    # log_softmax rows should (approximately) exponentiate-sum to 1.
    assert jnp.allclose(jnp.sum(jnp.exp(out), axis=1), 1.0, atol=1e-3)
    print("KERNEL_OK")
</pallas_src>

<mosaic_0001>
module attributes {stable_mosaic.version = 11 : i64} {
  func.func @xw_kernel(%arg0: i32, %arg1: memref<256x128xbf16, #tpu.memory_space<vmem>>, %arg2: memref<128x32xbf16, #tpu.memory_space<vmem>>, %arg3: memref<256x1xf32, #tpu.memory_space<vmem>>, %arg4: memref<256x32xbf16, #tpu.memory_space<vmem>>) attributes {dimension_semantics = [#tpu.dimension_semantics<parallel>], iteration_bounds = array<i64: 1>, scalar_prefetch = 0 : i64, scratch_operands = 0 : i64, tpu.core_type = #tpu.core_type<tc>, window_params = [{transform_indices = @transform_0, window_bounds = array<i64: 256, 128>}, {pipeline_mode = #tpu.pipeline_mode<synchronous>, transform_indices = @transform_1, window_bounds = array<i64: 128, 32>}, {transform_indices = @transform_2, window_bounds = array<i64: 256, 1>}, {transform_indices = @transform_3, window_bounds = array<i64: 256, 32>}]} {
    %c0 = arith.constant 0 : index
    %c0_0 = arith.constant 0 : index
    %0 = vector.load %arg1[%c0, %c0_0] : memref<256x128xbf16, #tpu.memory_space<vmem>>, vector<256x128xbf16>
    %c0_1 = arith.constant 0 : index
    %c0_2 = arith.constant 0 : index
    %1 = vector.load %arg2[%c0_1, %c0_2] : memref<128x32xbf16, #tpu.memory_space<vmem>>, vector<128x32xbf16>
    %cst = arith.constant dense<0.000000e+00> : vector<256x32xf32>
    %2 = tpu.matmul %0, %1, %cst {dimension_numbers = #tpu.dot_dimension_numbers<[1], [0], [0], [1], [0, 0, 1, 1], [], []>} : vector<256x128xbf16>, vector<128x32xbf16>, vector<256x32xf32> -> vector<256x32xf32>
    %c0_3 = arith.constant 0 : index
    %c0_4 = arith.constant 0 : index
    %3 = vector.load %arg3[%c0_3, %c0_4] : memref<256x1xf32, #tpu.memory_space<vmem>>, vector<256x1xf32>
    %4 = vector.broadcast %3 : vector<256x1xf32> to vector<256x32xf32>
    %5 = arith.mulf %2, %4 : vector<256x32xf32>
    %6 = arith.truncf %5 : vector<256x32xf32> to vector<256x32xbf16>
    %c0_5 = arith.constant 0 : index
    %c0_6 = arith.constant 0 : index
    %7 = vector.load %arg4[%c0_5, %c0_6] : memref<256x32xbf16, #tpu.memory_space<vmem>>, vector<256x32xbf16>
    tpu.vector_store %arg4[%c0_5, %c0_6], %6 {strides = array<i32>} : memref<256x32xbf16, #tpu.memory_space<vmem>>, vector<256x32xbf16>,
    return
  }
  func.func @transform_0(%arg0: i32) -> (i32, i32) {
    %c0_i32 = arith.constant 0 : i32
    %c0_i32_0 = arith.constant 0 : i32
    return %arg0, %c0_i32 : i32, i32
  }
  func.func @transform_1(%arg0: i32) -> (i32, i32) {
    %c0_i32 = arith.constant 0 : i32
    %c0_i32_0 = arith.constant 0 : i32
    %c0_i32_1 = arith.constant 0 : i32
    return %c0_i32, %c0_i32_0 : i32, i32
  }
  func.func @transform_2(%arg0: i32) -> (i32, i32) {
    %c0_i32 = arith.constant 0 : i32
    %c0_i32_0 = arith.constant 0 : i32
    return %arg0, %c0_i32 : i32, i32
  }
  func.func @transform_3(%arg0: i32) -> (i32, i32) {
    %c0_i32 = arith.constant 0 : i32
    %c0_i32_0 = arith.constant 0 : i32
    return %arg0, %c0_i32 : i32, i32
  }
}

</mosaic_0001>

<bundles_post_ra>
// kernel: tpu_custom_call.1
= control target key start
LH: loop header
LB: loop body
LE: loop exit
PB: predicated region body
PF: predicated region fallthrough
CT: control target
= control target key end

     0   :  { %v736_v0 = vmov 0   ;;  %vm551_vm0 = vcmask 257024   ;;  %s1095_s2 = inlined_call_operand.vmem [shape: f32[256,1], index: 2, kind: input, shape index: {}]   ;;  %s1096_s1 = inlined_call_operand.vmem [shape: bf16[128,32], index: 1, kind: input, shape index: {}]   ;;  %s1097_s0 = inlined_call_operand.vmem [shape: bf16[256,128], index: 0, kind: input, shape index: {}]   ;;  %s1098_s3 = inlined_call_operand.vmem [shape: bf16[256,32], index: 3, kind: output, shape index: {}]  }
   0x1   :  { %735 = vset.pattern.permute.xlu2 %v736_v0  ;;  %734 = vset.pattern.permute.xlu1 %v736_v0  ;;  %v299_v1 = vld [vmem:[%s1095_s2 + $0x20] sm:$0xff]  ;;  %v297_v2 = vld [vmem:[%s1095_s2 + $0x10] sm:$0xff]  ;;  %v707_v4 = vld [vmem:[%s1096_s1 + $0x38] sm:$0xff] }
   0x2   :  { %v295_v3 = vld [vmem:[%s1095_s2] sm:$0xff]  ;;  %733 = vset.pattern.permute.xlu0 %v736_v0  ;;  %349 = vperm.xlu2 %735, %v299_v1   ;;  %v706_v5 = vld [vmem:[%s1096_s1 + $0x30] sm:$0xff]  ;;  %v300_v6 = vld [vmem:[%s1095_s2 + $0x28] sm:$0xff] }
   0x3   :  { %339 = vperm.xlu1 %734, %v297_v2   ;;  %329 = vperm.xlu0 %733, %v295_v3   ;;  %v298_v7 = vld [vmem:[%s1095_s2 + $0x18] sm:$0xff]  ;;  %v296_v8 = vld [vmem:[%s1095_s2 + $0x8] sm:$0xff]  ;;  %v704_v10 = vld [vmem:[%s1096_s1 + $0x20] sm:$0xff] }
   0x4   :  { %206 = vmatpush.bf16.msra.mxu0 %v707_v4  ;;  %708 = vmatpush.bf16.msra.mxu1 %v707_v4  ;;  %v705_v9 = vld [vmem:[%s1096_s1 + $0x28] sm:$0xff]  ;;  %v303_v11 = vld [vmem:[%s1095_s2 + $0x40] sm:$0xff]  ;;  %v302_v12 = vld [vmem:[%s1095_s2 + $0x38] sm:$0xff] }
   0x5   :  { %709 = vmatpush.bf16.msra.mxu2 %v707_v4  ;;  %710 = vmatpush.bf16.msra.mxu3 %v707_v4  ;;  %v301_v13 = vld [vmem:[%s1095_s2 + $0x30] sm:$0xff]  ;;  %v703_v14 = vld [vmem:[%s1096_s1 + $0x18] sm:$0xff]  ;;  %v304_v18 = vld [vmem:[%s1095_s2 + $0x48] sm:$0xff] }
   0x6   :  { %v702_v15 = vld [vmem:[%s1096_s1 + $0x10] sm:$0xff]  ;;  %v306_v16 = vld [vmem:[%s1095_s2 + $0x58] sm:$0xff]  ;;  %v701_v19 = vld [vmem:[%s1096_s1 + $0x8] sm:$0xff] }
   0x7   :  { %v305_v17 = vld [vmem:[%s1095_s2 + $0x50] sm:$0xff]  ;;  %v700_v20 = vld [vmem:[%s1096_s1] sm:$0xff]  ;;  %v308_v22 = vld [vmem:[%s1095_s2 + $0x68] sm:$0xff] }
   0x8   :  { %207 = vmatpush.bf16.msra.mxu0 %v706_v5  ;;  %711 = vmatpush.bf16.msra.mxu1 %v706_v5  ;;  %v309_v21 = vld [vmem:[%s1095_s2 + $0x70] sm:$0xff]  ;;  %v307_v23 = vld [vmem:[%s1095_s2 + $0x60] sm:$0xff]  ;;  %v312_v28 = vld [vmem:[%s1095_s2 + $0x88] sm:$0xff] }
   0x9   :  { %712 = vmatpush.bf16.msra.mxu2 %v706_v5  ;;  %713 = vmatpush.bf16.msra.mxu3 %v706_v5  ;;  %v684_v24 = vld [vmem:[%s1097_s0] sm:$0xff]  ;;  %v310_v30 = vld [vmem:[%s1095_s2 + $0x78] sm:$0xff]  ;;  %v313_v33 = vld [vmem:[%s1095_s2 + $0x90] sm:$0xff] }
   0xa   :  { %354 = vperm.xlu2 %735, %v300_v6   ;;  %v688_v25 = vld [vmem:[%s1097_s0 + $0x20] sm:$0xff]  ;;  %v314_v32 = vld [vmem:[%s1095_s2 + $0x98] sm:$0xff]  ;;  %v685_v34 = vld [vmem:[%s1097_s0 + $0x8] sm:$0xff] }
   0xb   :  { %344 = vperm.xlu1 %734, %v298_v7   ;;  %334 = vperm.xlu0 %733, %v296_v8   ;;  %v692_v26 = vld [vmem:[%s1097_s0 + $0x40] sm:$0xff]  ;;  %v689_v35 = vld [vmem:[%s1097_s0 + $0x28] sm:$0xff]  ;;  %v318_v38 = vld [vmem:[%s1095_s2 + $0xb8] sm:$0xff] }
   0xc   :  { %208 = vmatpush.bf16.msra.mxu0 %v705_v9  ;;  %714 = vmatpush.bf16.msra.mxu1 %v705_v9  ;;  %v696_v27 = vld [vmem:[%s1097_s0 + $0x60] sm:$0xff]  ;;  %v693_v36 = vld [vmem:[%s1097_s0 + $0x48] sm:$0xff]  ;;  %v317_v39 = vld [vmem:[%s1095_s2 + $0xb0] sm:$0xff] }
   0xd   :  { %715 = vmatpush.bf16.msra.mxu2 %v705_v9  ;;  %716 = vmatpush.bf16.msra.mxu3 %v705_v9  ;;  %v311_v29 = vld [vmem:[%s1095_s2 + $0x80] sm:$0xff]  ;;  %v697_v37 = vld [vmem:[%s1097_s0 + $0x68] sm:$0xff]  ;;  %v321_v41 = vld [vmem:[%s1095_s2 + $0xd0] sm:$0xff] }
   0xe   :  { %v315_v31 = vld [vmem:[%s1095_s2 + $0xa0] sm:$0xff]  ;;  %v316_v40 = vld [vmem:[%s1095_s2 + $0xa8] sm:$0xff]  ;;  %v686_v44 = vld [vmem:[%s1097_s0 + $0x10] sm:$0xff] }
   0xf   :  { %v320_v42 = vld [vmem:[%s1095_s2 + $0xc8] sm:$0xff]  ;;  %v319_v43 = vld [vmem:[%s1095_s2 + $0xc0] sm:$0xff]  ;;  %v690_v45 = vld [vmem:[%s1097_s0 + $0x30] sm:$0xff] }
  0x10   :  { %209 = vmatpush.bf16.msra.mxu0 %v704_v10  ;;  %717 = vmatpush.bf16.msra.mxu1 %v704_v10  ;;  %v694_v46 = vld [vmem:[%s1097_s0 + $0x50] sm:$0xff]  ;;  %v324_v48 = vld [vmem:[%s1095_s2 + $0xe8] sm:$0xff]  ;;  %v323_v49 = vld [vmem:[%s1095_s2 + $0xe0] sm:$0xff] }
  0x11   :  { %718 = vmatpush.bf16.msra.mxu2 %v704_v10  ;;  %719 = vmatpush.bf16.msra.mxu3 %v704_v10  ;;  %v698_v47 = vld [vmem:[%s1097_s0 + $0x70] sm:$0xff]  ;;  %v322_v50 = vld [vmem:[%s1095_s2 + $0xd8] sm:$0xff] }
  0x12   :  { %369 = vperm.xlu2 %735, %v303_v11   ;;  %v326_v51 = vld [vmem:[%s1095_s2 + $0xf8] sm:$0xff]  ;;  %v325_v52 = vld [vmem:[%s1095_s2 + $0xf0] sm:$0xff] }
  0x13   :  { %364 = vperm.xlu1 %734, %v302_v12   ;;  %359 = vperm.xlu0 %733, %v301_v13   ;;  %v687_v53 = vld [vmem:[%s1097_s0 + $0x18] sm:$0xff] }
  0x14   :  { %210 = vmatpush.bf16.msra.mxu0 %v703_v14  ;;  %720 = vmatpush.bf16.msra.mxu1 %v703_v14  ;;  %v691_v54 = vld [vmem:[%s1097_s0 + $0x38] sm:$0xff] }
  0x15   :  { %721 = vmatpush.bf16.msra.mxu2 %v703_v14  ;;  %722 = vmatpush.bf16.msra.mxu3 %v703_v14  ;;  %v695_v55 = vld [vmem:[%s1097_s0 + $0x58] sm:$0xff] }
  0x16   :  { %v699_v56 = vld [vmem:[%s1097_s0 + $0x78] sm:$0xff] }
  0x18   :  { %211 = vmatpush.bf16.msra.mxu0 %v702_v15  ;;  %723 = vmatpush.bf16.msra.mxu1 %v702_v15 }
  0x19   :  { %724 = vmatpush.bf16.msra.mxu2 %v702_v15  ;;  %725 = vmatpush.bf16.msra.mxu3 %v702_v15 }
  0x1a   :  { %384 = vperm.xlu2 %735, %v306_v16  }
  0x1b   :  { %379 = vperm.xlu1 %734, %v305_v17   ;;  %374 = vperm.xlu0 %733, %v304_v18  }
  0x1c   :  { %212 = vmatpush.bf16.msra.mxu0 %v701_v19  ;;  %726 = vmatpush.bf16.msra.mxu1 %v701_v19 }
  0x1d   :  { %727 = vmatpush.bf16.msra.mxu2 %v701_v19  ;;  %728 = vmatpush.bf16.msra.mxu3 %v701_v19 }
  0x20   :  { %213 = vmatpush.bf16.msra.mxu0 %v700_v20  ;;  %729 = vmatpush.bf16.msra.mxu1 %v700_v20 }
  0x21   :  { %730 = vmatpush.bf16.msra.mxu2 %v700_v20  ;;  %731 = vmatpush.bf16.msra.mxu3 %v700_v20 }
  0x22   :  { %399 = vperm.xlu2 %735, %v309_v21  }
  0x23   :  { %394 = vperm.xlu1 %734, %v308_v22   ;;  %389 = vperm.xlu0 %733, %v307_v23  }
  0x24   :  { %214 = vmatmul.bf16.vlgmr.msra.gmra.mxu0 %v684_v24  ;;  %234 = vmatmul.bf16.vlgmr.msra.gmra.mxu1 %v688_v25 }
  0x25   :  { %254 = vmatmul.bf16.vlgmr.msra.gmra.mxu2 %v692_v26  ;;  %274 = vmatmul.bf16.vlgmr.msra.gmra.mxu3 %v696_v27 }
  0x2a   :  { %414 = vperm.xlu2 %735, %v312_v28  }
  0x2b   :  { %409 = vperm.xlu1 %734, %v311_v29   ;;  %404 = vperm.xlu0 %733, %v310_v30  }
  0x32   :  { %429 = vperm.xlu2 %735, %v315_v31  }
  0x33   :  { %424 = vperm.xlu1 %734, %v314_v32   ;;  %419 = vperm.xlu0 %733, %v313_v33  }
  0x34   :  { %219 = vmatmul.bf16.gmra.mxu0 %v685_v34  ;;  %239 = vmatmul.bf16.gmra.mxu1 %v689_v35 }
  0x35   :  { %259 = vmatmul.bf16.gmra.mxu2 %v693_v36  ;;  %279 = vmatmul.bf16.gmra.mxu3 %v697_v37 }
  0x3a   :  { %444 = vperm.xlu2 %735, %v318_v38  }
  0x3b   :  { %439 = vperm.xlu1 %734, %v317_v39   ;;  %434 = vperm.xlu0 %733, %v316_v40  }
  0x42   :  { %459 = vperm.xlu2 %735, %v321_v41  }
  0x43   :  { %454 = vperm.xlu1 %734, %v320_v42   ;;  %449 = vperm.xlu0 %733, %v319_v43  }
  0x44   :  { %224 = vmatmul.bf16.gmra.mxu0 %v686_v44  ;;  %244 = vmatmul.bf16.gmra.mxu1 %v690_v45 }
  0x45   :  { %264 = vmatmul.bf16.gmra.mxu2 %v694_v46  ;;  %284 = vmatmul.bf16.gmra.mxu3 %v698_v47 }
  0x4a   :  { %474 = vperm.xlu2 %735, %v324_v48  }
  0x4b   :  { %469 = vperm.xlu1 %734, %v323_v49   ;;  %464 = vperm.xlu0 %733, %v322_v50  }
  0x53   :  { %484 = vperm.xlu1 %734, %v326_v51   ;;  %479 = vperm.xlu0 %733, %v325_v52  }
  0x54   :  { %229 = vmatmul.bf16.gmra.mxu0 %v687_v53  ;;  %249 = vmatmul.bf16.gmra.mxu1 %v691_v54 }
  0x55   :  { %269 = vmatmul.bf16.gmra.mxu2 %v695_v55  ;;  %289 = vmatmul.bf16.gmra.mxu3 %v699_v56 }
  0x5c   :  { %v925_v57 = vpop.permute.xlu2 %349 }
  0x64   :  { %v927_v58 = vpop.permute.xlu2 %354 }
  0x6c   :  { %v370_v61 = vpop.permute.xlu2 %369 }
  0x74   :  { %v931_v0 = vpop.permute.xlu2 %384 }
  0x75   :  { %v340_v59 = vpop.permute.xlu1 %339  ;;  %v330_v60 = vpop.permute.xlu0 %329 }
  0x7c   :  { %v937_v5 = vpop.permute.xlu2 %399 }
  0x7d   :  { %v929_v62 = vpop.permute.xlu1 %344  ;;  %v335_v63 = vpop.permute.xlu0 %334 }
  0x84   :  { %v415_v8 = vpop.permute.xlu2 %414 }
  0x85   :  { %v933_v1 = vpop.permute.xlu1 %364  ;;  %v935_v2 = vpop.permute.xlu0 %359 }
  0x8c   :  { %v945_v13 = vpop.permute.xlu2 %429 }
  0x8d   :  { %v380_v3 = vpop.permute.xlu1 %379  ;;  %v375_v4 = vpop.permute.xlu0 %374 }
  0x94   :  { %v955_v28 = vpop.permute.xlu2 %444 }
  0x95   :  { %v939_v6 = vpop.permute.xlu1 %394  ;;  %v941_v7 = vpop.permute.xlu0 %389 }
  0x9c   :  { %v460_v47 = vpop.permute.xlu2 %459 }
  0x9d   :  { %v410_v9 = vpop.permute.xlu1 %409  ;;  %v943_v10 = vpop.permute.xlu0 %404 }
  0xa1   :  { %v215_v11 = vpop.f32.mrf.mxu0  ;;  %v235_v12 = vpop.f32.mrf.mxu1 }
  0xa2   :  { %v487_v14 = vmul.f32 %v330_v60, %v215_v11  ;;  %v495_v15 = vmul.f32 %v370_v61, %v235_v12 }
  0xa4   :  { %v519_v16 = vpack.c.bf16 %v487_v14, %v487_v14  ;;  %v527_v17 = vpack.c.bf16 %v495_v15, %v495_v15 }
  0xa5   :  { %v425_v18 = vpop.permute.xlu1 %424  ;;  %v420_v19 = vpop.permute.xlu0 %419 }
  0xa6   :  { %552 = vst.msk [vmem:[%s1098_s3] sm:$0xf] %vm551_vm0, %v519_v16 }
  0xa7   :  { %560 = vst.msk [vmem:[%s1098_s3 + $0x20] sm:$0xf] %vm551_vm0, %v527_v17 }
  0xa8   :  { %v255_v20 = vpop.f32.mrf.mxu2  ;;  %v275_v21 = vpop.f32.mrf.mxu3 }
  0xa9   :  { %v503_v22 = vmul.f32 %v410_v9, %v255_v20  ;;  %v217_v23 = vpop.f32.mrf.mxu0  ;;  %v237_v24 = vpop.f32.mrf.mxu1 }
  0xaa   :  { %v488_v25 = vmul.f32 %v335_v63, %v217_v23  ;;  %v496_v26 = vmul.f32 %v375_v4, %v237_v24 }
  0xab   :  { %v535_v27 = vpack.c.bf16 %v503_v22, %v503_v22 }
  0xac   :  { %v520_v29 = vpack.c.bf16 %v488_v25, %v488_v25  ;;  %v528_v30 = vpack.c.bf16 %v496_v26, %v496_v26 }
  0xad   :  { %568 = vst.msk [vmem:[%s1098_s3 + $0x40] sm:$0xf] %vm551_vm0, %v535_v27  ;;  %v961_v31 = vpop.permute.xlu1 %439  ;;  %v963_v32 = vpop.permute.xlu0 %434 }
  0xae   :  { %553 = vst.msk [vmem:[%s1098_s3 + $0x4] sm:$0xf] %vm551_vm0, %v520_v29 }
  0xaf   :  { %561 = vst.msk [vmem:[%s1098_s3 + $0x24] sm:$0xf] %vm551_vm0, %v528_v30 }
  0xb0   :  { %v257_v33 = vpop.f32.mrf.mxu2  ;;  %v277_v34 = vpop.f32.mrf.mxu3 }
  0xb1   :  { %v504_v35 = vmul.f32 %v415_v8, %v257_v33  ;;  %v220_v36 = vpop.f32.mrf.mxu0  ;;  %v240_v37 = vpop.f32.mrf.mxu1 }
  0xb2   :  { %v489_v38 = vmul.f32 %v340_v59, %v220_v36  ;;  %v497_v39 = vmul.f32 %v380_v3, %v240_v37 }
  0xb3   :  { %v536_v40 = vpack.c.bf16 %v504_v35, %v504_v35 }
  0xb4   :  { %v521_v41 = vpack.c.bf16 %v489_v38, %v489_v38  ;;  %v529_v42 = vpack.c.bf16 %v497_v39, %v497_v39 }
  0xb5   :  { %569 = vst.msk [vmem:[%s1098_s3 + $0x44] sm:$0xf] %vm551_vm0, %v536_v40  ;;  %v455_v43 = vpop.permute.xlu1 %454  ;;  %v450_v44 = vpop.permute.xlu0 %449 }
  0xb6   :  { %554 = vst.msk [vmem:[%s1098_s3 + $0x8] sm:$0xf] %vm551_vm0, %v521_v41  ;;  %v512_v45 = vmul.f32 %v455_v43, %v277_v34  ;;  %v511_v46 = vmul.f32 %v450_v44, %v275_v21 }
  0xb7   :  { %562 = vst.msk [vmem:[%s1098_s3 + $0x28] sm:$0xf] %vm551_vm0, %v529_v42 }
  0xb8   :  { %v544_v48 = vpack.c.bf16 %v512_v45, %v512_v45  ;;  %v543_v49 = vpack.c.bf16 %v511_v46, %v511_v46  ;;  %v260_v50 = vpop.f32.mrf.mxu2  ;;  %v280_v51 = vpop.f32.mrf.mxu3 }
  0xb9   :  { %v505_v52 = vmul.f32 %v420_v19, %v260_v50  ;;  %v513_v53 = vmul.f32 %v460_v47, %v280_v51  ;;  %v222_v54 = vpop.f32.mrf.mxu0  ;;  %v242_v55 = vpop.f32.mrf.mxu1 }
  0xba   :  { %577 = vst.msk [vmem:[%s1098_s3 + $0x64] sm:$0xf] %vm551_vm0, %v544_v48  ;;  %v490_v56 = vmul.f32 %v929_v62, %v222_v54  ;;  %v498_v59 = vmul.f32 %v931_v0, %v242_v55 }
  0xbb   :  { %576 = vst.msk [vmem:[%s1098_s3 + $0x60] sm:$0xf] %vm551_vm0, %v543_v49  ;;  %v537_v60 = vpack.c.bf16 %v505_v52, %v505_v52  ;;  %v545_v61 = vpack.c.bf16 %v513_v53, %v513_v53 }
  0xbc   :  { %v522_v63 = vpack.c.bf16 %v490_v56, %v490_v56  ;;  %v530_v3 = vpack.c.bf16 %v498_v59, %v498_v59 }
  0xbd   :  { %570 = vst.msk [vmem:[%s1098_s3 + $0x48] sm:$0xf] %vm551_vm0, %v537_v60  ;;  %v465_v62 = vpop.permute.xlu0 %464 }
  0xbe   :  { %578 = vst.msk [vmem:[%s1098_s3 + $0x68] sm:$0xf] %vm551_vm0, %v545_v61 }
  0xbf   :  { %555 = vst.msk [vmem:[%s1098_s3 + $0xc] sm:$0xf] %vm551_vm0, %v522_v63 }
  0xc0   :  { %563 = vst.msk [vmem:[%s1098_s3 + $0x2c] sm:$0xf] %vm551_vm0, %v530_v3  ;;  %v262_v0 = vpop.f32.mrf.mxu2  ;;  %v282_v4 = vpop.f32.mrf.mxu3 }
  0xc1   :  { %v506_v8 = vmul.f32 %v425_v18, %v262_v0  ;;  %v514_v9 = vmul.f32 %v465_v62, %v282_v4  ;;  %v225_v11 = vpop.f32.mrf.mxu0  ;;  %v245_v12 = vpop.f32.mrf.mxu1 }
  0xc2   :  { %v491_v14 = vmul.f32 %v925_v57, %v225_v11  ;;  %v499_v15 = vmul.f32 %v941_v7, %v245_v12  ;;  %v470_v18 = vpop.permute.xlu1 %469 }
  0xc3   :  { %v538_v16 = vpack.c.bf16 %v506_v8, %v506_v8  ;;  %v546_v17 = vpack.c.bf16 %v514_v9, %v514_v9 }
  0xc4   :  { %v523_v19 = vpack.c.bf16 %v491_v14, %v491_v14  ;;  %v531_v20 = vpack.c.bf16 %v499_v15, %v499_v15 }
  0xc5   :  { %571 = vst.msk [vmem:[%s1098_s3 + $0x4c] sm:$0xf] %vm551_vm0, %v538_v16 }
  0xc6   :  { %579 = vst.msk [vmem:[%s1098_s3 + $0x6c] sm:$0xf] %vm551_vm0, %v546_v17 }
  0xc7   :  { %556 = vst.msk [vmem:[%s1098_s3 + $0x10] sm:$0xf] %vm551_vm0, %v523_v19 }
  0xc8   :  { %564 = vst.msk [vmem:[%s1098_s3 + $0x30] sm:$0xf] %vm551_vm0, %v531_v20  ;;  %v265_v57 = vpop.f32.mrf.mxu2  ;;  %v285_v7 = vpop.f32.mrf.mxu3 }
  0xc9   :  { %v507_v21 = vmul.f32 %v945_v13, %v265_v57  ;;  %v515_v22 = vmul.f32 %v470_v18, %v285_v7  ;;  %v227_v23 = vpop.f32.mrf.mxu0  ;;  %v247_v24 = vpop.f32.mrf.mxu1 }
  0xca   :  { %v492_v25 = vmul.f32 %v927_v58, %v227_v23  ;;  %v500_v26 = vmul.f32 %v939_v6, %v247_v24  ;;  %v475_v13 = vpop.permute.xlu2 %474 }
  0xcb   :  { %v539_v27 = vpack.c.bf16 %v507_v21, %v507_v21  ;;  %v547_v29 = vpack.c.bf16 %v515_v22, %v515_v22 }
  0xcc   :  { %v524_v30 = vpack.c.bf16 %v492_v25, %v492_v25  ;;  %v532_v33 = vpack.c.bf16 %v500_v26, %v500_v26 }
  0xcd   :  { %572 = vst.msk [vmem:[%s1098_s3 + $0x50] sm:$0xf] %vm551_vm0, %v539_v27 }
  0xce   :  { %580 = vst.msk [vmem:[%s1098_s3 + $0x70] sm:$0xf] %vm551_vm0, %v547_v29 }
  0xcf   :  { %557 = vst.msk [vmem:[%s1098_s3 + $0x14] sm:$0xf] %vm551_vm0, %v524_v30 }
  0xd0   :  { %565 = vst.msk [vmem:[%s1098_s3 + $0x34] sm:$0xf] %vm551_vm0, %v532_v33  ;;  %v267_v58 = vpop.f32.mrf.mxu2  ;;  %v287_v6 = vpop.f32.mrf.mxu3 }
  0xd1   :  { %v508_v34 = vmul.f32 %v963_v32, %v267_v58  ;;  %v516_v35 = vmul.f32 %v475_v13, %v287_v6  ;;  %v230_v36 = vpop.f32.mrf.mxu0  ;;  %v250_v37 = vpop.f32.mrf.mxu1 }
  0xd2   :  { %v493_v38 = vmul.f32 %v935_v2, %v230_v36  ;;  %v501_v39 = vmul.f32 %v937_v5, %v250_v37  ;;  %v480_v32 = vpop.permute.xlu0 %479 }
  0xd3   :  { %v540_v40 = vpack.c.bf16 %v508_v34, %v508_v34  ;;  %v548_v41 = vpack.c.bf16 %v516_v35, %v516_v35 }
  0xd4   :  { %v525_v42 = vpack.c.bf16 %v493_v38, %v493_v38  ;;  %v533_v43 = vpack.c.bf16 %v501_v39, %v501_v39 }
  0xd5   :  { %573 = vst.msk [vmem:[%s1098_s3 + $0x54] sm:$0xf] %vm551_vm0, %v540_v40 }
  0xd6   :  { %581 = vst.msk [vmem:[%s1098_s3 + $0x74] sm:$0xf] %vm551_vm0, %v548_v41 }
  0xd7   :  { %558 = vst.msk [vmem:[%s1098_s3 + $0x18] sm:$0xf] %vm551_vm0, %v525_v42 }
  0xd8   :  { %566 = vst.msk [vmem:[%s1098_s3 + $0x38] sm:$0xf] %vm551_vm0, %v533_v43  ;;  %v270_v2 = vpop.f32.mrf.mxu2  ;;  %v290_v5 = vpop.f32.mrf.mxu3 }
  0xd9   :  { %v509_v44 = vmul.f32 %v961_v31, %v270_v2  ;;  %v517_v45 = vmul.f32 %v480_v32, %v290_v5  ;;  %v232_v46 = vpop.f32.mrf.mxu0  ;;  %v252_v47 = vpop.f32.mrf.mxu1 }
  0xda   :  { %v494_v48 = vmul.f32 %v933_v1, %v232_v46  ;;  %v502_v49 = vmul.f32 %v943_v10, %v252_v47  ;;  %v485_v31 = vpop.permute.xlu1 %484 }
  0xdb   :  { %v541_v50 = vpack.c.bf16 %v509_v44, %v509_v44  ;;  %v549_v51 = vpack.c.bf16 %v517_v45, %v517_v45 }
  0xdc   :  { %v526_v52 = vpack.c.bf16 %v494_v48, %v494_v48  ;;  %v534_v53 = vpack.c.bf16 %v502_v49, %v502_v49 }
  0xdd   :  { %574 = vst.msk [vmem:[%s1098_s3 + $0x58] sm:$0xf] %vm551_vm0, %v541_v50 }
  0xde   :  { %582 = vst.msk [vmem:[%s1098_s3 + $0x78] sm:$0xf] %vm551_vm0, %v549_v51 }
  0xdf   :  { %559 = vst.msk [vmem:[%s1098_s3 + $0x1c] sm:$0xf] %vm551_vm0, %v526_v52 }
  0xe0   :  { %567 = vst.msk [vmem:[%s1098_s3 + $0x3c] sm:$0xf] %vm551_vm0, %v534_v53  ;;  %v272_v1 = vpop.f32.mrf.mxu2  ;;  %v292_v10 = vpop.f32.mrf.mxu3 }
  0xe1   :  { %v510_v54 = vmul.f32 %v955_v28, %v272_v1  ;;  %v518_v55 = vmul.f32 %v485_v31, %v292_v10 }
  0xe3   :  { %v542_v56 = vpack.c.bf16 %v510_v54, %v510_v54  ;;  %v550_v59 = vpack.c.bf16 %v518_v55, %v518_v55 }
  0xe5   :  { %575 = vst.msk [vmem:[%s1098_s3 + $0x5c] sm:$0xf] %vm551_vm0, %v542_v56 }
  0xe6   :  { %583 = vst.msk [vmem:[%s1098_s3 + $0x7c] sm:$0xf] %vm551_vm0, %v550_v59 }

</bundles_post_ra>
